<compile_context>
chip_gen: v5e
topology: v5e:2x2
jax: 0.10.0
libtpu: 0.0.40
codegen_flags: <defaults>
</compile_context>

<pallas_src>
import functools
import math

import jax
import jax.numpy as jnp
from jax import lax
from jax.experimental import pallas as pl
from jax.experimental.pallas import tpu as pltpu


def _round_up(x: int, m: int) -> int:
    return ((x + m - 1) // m) * m


# ----------------------------------------------------------------------------
# Kernel 1: preprocess — x.float() / 255.0  (elementwise, HBM-bandwidth bound)
# ----------------------------------------------------------------------------
def _preprocess_kernel(img_ref, out_ref):
    x = img_ref[...].astype(jnp.float32) * jnp.float32(1.0 / 255.0)
    out_ref[...] = x.astype(out_ref.dtype)


def _choose_nopad_layout(total: int, out_itemsize: int, target_block_bytes: int = 2 << 20):
    """Find a (rows, lanes, row_tile) factorization of `total` elements that needs
    no padding. Prefers layouts that give a lane-dense tile and >=2 grid steps."""
    fallback = None
    for lanes in (1024, 512, 256, 128):
        if total % lanes:
            continue
        rows = total // lanes
        if rows % 8 == 0 and rows >= 16:
            # ~target_block_bytes of output per step, and at least 2 grid steps.
            target_rows = max(8, (target_block_bytes // out_itemsize) // lanes)
            target_rows = max(8, min(target_rows, rows // 2))
            target_rows = (target_rows // 8) * 8
            t = min(rows, target_rows)
            while t >= 8:
                if rows % t == 0:
                    return rows, lanes, t
                t -= 8
        if fallback is None:
            # tiny input: single block covering the whole array (block == array dims)
            fallback = (rows, lanes, rows)
    return fallback


def preprocess(images: jax.Array, *, out_dtype=jnp.float32) -> jax.Array:
    """images: [B, C, H, W] (uint8 or any real dtype, values in [0, 255]) -> float / 255."""
    orig_shape = images.shape
    total = math.prod(orig_shape)
    out_itemsize = jnp.dtype(out_dtype).itemsize

    layout = _choose_nopad_layout(total, out_itemsize)
    if layout is not None:
        rows, lanes, row_tile = layout
        x2d = images.reshape(rows, lanes)          # pure metadata reshape, no pad
        crop_to = None
    else:
        # Misaligned tail: pad once (rare path — typical detector shapes are aligned).
        lanes = 128
        rows_raw = pl.cdiv(total, lanes)
        row_tile = min(2048, _round_up(rows_raw, 8))
        rows = _round_up(rows_raw, row_tile)
        flat = jnp.pad(images.reshape(-1), (0, rows * lanes - total))
        x2d = flat.reshape(rows, lanes)
        crop_to = total

    in_bytes = rows * lanes * jnp.dtype(images.dtype).itemsize
    out_bytes = rows * lanes * out_itemsize

    out2d = pl.pallas_call(
        _preprocess_kernel,
        out_shape=jax.ShapeDtypeStruct((rows, lanes), out_dtype),
        grid=(rows // row_tile,),
        in_specs=[pl.BlockSpec((row_tile, lanes), lambda i: (i, 0))],
        out_specs=pl.BlockSpec((row_tile, lanes), lambda i: (i, 0)),
        compiler_params=pltpu.CompilerParams(dimension_semantics=("parallel",)),
        cost_estimate=pl.CostEstimate(
            flops=rows * lanes,
            transcendentals=0,
            bytes_accessed=in_bytes + out_bytes,
        ),
    )(x2d)

    if crop_to is None:
        return out2d.reshape(orig_shape)
    return out2d.reshape(-1)[:crop_to].reshape(orig_shape)


# ----------------------------------------------------------------------------
# Kernel 2: compute_iou — pairwise IoU between box1 [N,4] and box2 [M,4].
# box2 arrives transposed ([4, M_pad]) so every broadcast is sublane x lane.
# Rows are strip-mined in sublane chunks so intermediates stay in vregs.
# ----------------------------------------------------------------------------
def _iou_kernel(b1_ref, b2t_ref, iou_ref, *, chunk: int):
    b2t = b2t_ref[...].astype(jnp.float32)                       # [4, tM] — tiny, resident
    b2_x1, b2_y1 = b2t[0:1, :], b2t[1:2, :]
    b2_x2, b2_y2 = b2t[2:3, :], b2t[3:4, :]
    area2 = (b2_x2 - b2_x1) * (b2_y2 - b2_y1)                    # [1, tM]

    tN = iou_ref.shape[0]

    def body(c, carry):
        r0 = pl.multiple_of(c * chunk, chunk)
        b1 = b1_ref[pl.ds(r0, chunk), :].astype(jnp.float32)     # [chunk, 4]
        w = jnp.maximum(
            jnp.minimum(b1[:, 2:3], b2_x2) - jnp.maximum(b1[:, 0:1], b2_x1), 0.0)
        h = jnp.maximum(
            jnp.minimum(b1[:, 3:4], b2_y2) - jnp.maximum(b1[:, 1:2], b2_y1), 0.0)
        inter = w * h                                            # [chunk, tM]
        area1 = (b1[:, 2:3] - b1[:, 0:1]) * (b1[:, 3:4] - b1[:, 1:2])   # [chunk, 1]
        union = (area1 + area2) - inter + jnp.float32(1e-6)
        r = pl.reciprocal(union, approx=True)                    # EUP slot (free-ish)
        r = r * (jnp.float32(2.0) - union * r)                   # 1 NR step -> near-exact
        iou_ref[pl.ds(r0, chunk), :] = inter * r
        return carry

    lax.fori_loop(0, tN // chunk, body, 0)


def compute_iou(box1: jax.Array, box2: jax.Array, *, tn_max: int = 256, tm_max: int = 512) -> jax.Array:
    """box1: [N, 4], box2: [M, 4] -> IoU matrix [N, M] (float32)."""
    N = box1.shape[0]
    M = box2.shape[0]

    tN = min(tn_max, _round_up(N, 8))        # sublane-aligned row tile
    tM = min(tm_max, _round_up(M, 128))      # lane-dense column tile
    N_pad = _round_up(N, tN)
    M_pad = _round_up(M, tM)

    b1 = box1.astype(jnp.float32)
    if N_pad != N:
        b1 = jnp.pad(b1, ((0, N_pad - N), (0, 0)))
    b2 = box2.astype(jnp.float32)
    if M_pad != M:
        b2 = jnp.pad(b2, ((0, M_pad - M), (0, 0)))
    b2t = b2.T                                # [4, M_pad] wrapper-side layout plumbing

    chunk = 16 if tN % 16 == 0 else 8        # per-chunk temps stay within the vreg file
    kernel = functools.partial(_iou_kernel, chunk=chunk)

    grid = (N_pad // tN, M_pad // tM)

    iou_pad = pl.pallas_call(
        kernel,
        out_shape=jax.ShapeDtypeStruct((N_pad, M_pad), jnp.float32),
        grid=grid,
        in_specs=[
            # box1 block is constant across j -> its DMA is reused over the M axis.
            pl.BlockSpec((tN, 4), lambda i, j: (i, 0)),
            pl.BlockSpec((4, tM), lambda i, j: (0, j)),
        ],
        out_specs=pl.BlockSpec((tN, tM), lambda i, j: (i, j)),
        compiler_params=pltpu.CompilerParams(
            dimension_semantics=("parallel", "parallel")
        ),
        cost_estimate=pl.CostEstimate(
            flops=16 * N_pad * M_pad,
            transcendentals=N_pad * M_pad,
            bytes_accessed=N_pad * 16 + M_pad * 16 + N_pad * M_pad * 4,
        ),
    )(b1, b2t)

    # Crop only when padding was actually added (avoids an extra full pass over
    # the dominant output array for aligned anchor/box counts).
    if N_pad == N and M_pad == M:
        return iou_pad
    return iou_pad[:N, :M]


# ----------------------------------------------------------------------------
# Thin JAX-side "BaseDetector" mirroring the concrete PyTorch methods.
# ----------------------------------------------------------------------------
class BaseDetectorPallas:
    def __init__(self, config):
        self.config = config
        self.num_classes = config["data"]["num_classes"]

    def preprocess(self, images):
        # hasattr(self, 'input_size') is False for the base class -> no resize.
        return preprocess(images)

    def compute_iou(self, box1, box2):
        return compute_iou(box1, box2)


# ----------------------------------------------------------------------------
# Reference implementations (pure JAX) for a correctness check.
# ----------------------------------------------------------------------------
def _preprocess_ref(images):
    return images.astype(jnp.float32) / 255.0


def _iou_ref(box1, box2):
    x1 = jnp.maximum(box1[:, None, 0], box2[:, 0])
    y1 = jnp.maximum(box1[:, None, 1], box2[:, 1])
    x2 = jnp.minimum(box1[:, None, 2], box2[:, 2])
    y2 = jnp.minimum(box1[:, None, 3], box2[:, 3])
    inter = jnp.clip(x2 - x1, 0) * jnp.clip(y2 - y1, 0)
    a1 = (box1[:, 2] - box1[:, 0]) * (box1[:, 3] - box1[:, 1])
    a2 = (box2[:, 2] - box2[:, 0]) * (box2[:, 3] - box2[:, 1])
    union = a1[:, None] + a2 - inter
    return inter / (union + 1e-06)


if __name__ == "__main__":
    key = jax.random.PRNGKey(0)
    k_img, k_b1, k_b2, k_b3, k_b4 = jax.random.split(key, 5)

    config = {"data": {"num_classes": 4}}
    det = BaseDetectorPallas(config)

    # synthetic uint8 image batch [B, C, H, W] (kernel casts in VMEM -> 4x fewer read bytes)
    images = jax.random.randint(k_img, (2, 4, 16, 16), 0, 256, jnp.int32).astype(jnp.uint8)

    # synthetic boxes: [x1, y1, x2, y2] with x2>x1, y2>y1
    def make_boxes(k, n):
        xy = jax.random.uniform(k, (n, 2), jnp.float32, 0.0, 10.0)
        wh = jax.random.uniform(jax.random.fold_in(k, 1), (n, 2), jnp.float32, 1.0, 6.0)
        return jnp.concatenate([xy, xy + wh], axis=-1)

    box1 = make_boxes(k_b1, 8)
    box2 = make_boxes(k_b2, 8)

    pre = jax.block_until_ready(det.preprocess(images))
    iou = jax.block_until_ready(det.compute_iou(box1, box2))

    # exercise padding / lane-dense tiling / strip-mined rows on non-aligned sizes too
    box3 = make_boxes(k_b3, 40)
    box4 = make_boxes(k_b4, 150)
    iou2 = jax.block_until_ready(det.compute_iou(box3, box4))

    # correctness checks against pure-JAX reference
    assert jnp.allclose(pre, _preprocess_ref(images), atol=1e-6)
    # approx reciprocal + 1 Newton-Raphson step -> near-exact IoU
    assert jnp.allclose(iou, _iou_ref(box1, box2), atol=1e-4, rtol=1e-4)
    assert jnp.allclose(iou2, _iou_ref(box3, box4), atol=1e-4, rtol=1e-4)
    assert pre.shape == (2, 4, 16, 16) and pre.dtype == jnp.float32
    assert iou.shape == (8, 8) and iou.dtype == jnp.float32
    assert iou2.shape == (40, 150) and iou2.dtype == jnp.float32

    print("KERNEL_OK")
</pallas_src>

<mosaic_0001>
module attributes {stable_mosaic.version = 11 : i64} {
  func.func @_preprocess_kernel(%arg0: i32, %arg1: memref<8x128xi8, #tpu.memory_space<vmem>>, %arg2: memref<8x128xf32, #tpu.memory_space<vmem>>) attributes {dimension_semantics = [#tpu.dimension_semantics<parallel>], iteration_bounds = array<i64: 2>, scalar_prefetch = 0 : i64, scratch_operands = 0 : i64, tpu.core_type = #tpu.core_type<tc>, window_params = [{transform_indices = @transform_0, window_bounds = array<i64: 8, 128>}, {transform_indices = @transform_1, window_bounds = array<i64: 8, 128>}]} {
    %c0 = arith.constant 0 : index
    %c0_0 = arith.constant 0 : index
    %0 = vector.load %arg1[%c0, %c0_0] : memref<8x128xi8, #tpu.memory_space<vmem>>, vector<8x128xi8>
    %1 = arith.uitofp %0 : vector<8x128xi8> to vector<8x128xf32>
    %cst = arith.constant 0.00392156886 : f32
    %2 = vector.broadcast %cst : f32 to vector<8x128xf32>
    %3 = arith.mulf %1, %2 : vector<8x128xf32>
    %c0_1 = arith.constant 0 : index
    %c0_2 = arith.constant 0 : index
    %4 = vector.load %arg2[%c0_1, %c0_2] : memref<8x128xf32, #tpu.memory_space<vmem>>, vector<8x128xf32>
    tpu.vector_store %arg2[%c0_1, %c0_2], %3 {strides = array<i32>} : memref<8x128xf32, #tpu.memory_space<vmem>>, vector<8x128xf32>,
    return
  }
  func.func @transform_0(%arg0: i32) -> (i32, i32) {
    %c0_i32 = arith.constant 0 : i32
    %c0_i32_0 = arith.constant 0 : i32
    return %arg0, %c0_i32 : i32, i32
  }
  func.func @transform_1(%arg0: i32) -> (i32, i32) {
    %c0_i32 = arith.constant 0 : i32
    %c0_i32_0 = arith.constant 0 : i32
    return %arg0, %c0_i32 : i32, i32
  }
}

</mosaic_0001>

<bundles_post_ra>
// kernel: tpu_custom_call.1
= control target key start
LH: loop header
LB: loop body
LE: loop exit
PB: predicated region body
PF: predicated region fallthrough
CT: control target
= control target key end

     0   :  { %6 = vsyncpa [#allocation3], 0  ;;  %s520_s0 = inlined_call_operand.hbm [shape: u8[16,128], index: 0, kind: input, shape index: {}]   ;;  %s521_s1 = inlined_call_operand.hbm [shape: f32[16,128], index: 1, kind: output, shape index: {}]  }
   0x1   :  { %8 = vsyncpa [#allocation3 + $0x1], 0 }
   0x2   :  { %9 = vsyncpa [#allocation4], 0 }
   0x3   :  { %11 = vsyncpa [#allocation4 + $0x1], 0  ;;  %s392_s6 = smov 0   ;;  %s394_s7 = smov 0  }
   0x4   :  { %s396_s8 = smov 0   ;;  %s398_s9 = smov 0  }
   0x5 LB: > { %s413_s10 = sadd.s32 4294967295, %s380_s9   ;;  %s226_s11 = sadd.s32 4294967294, %s380_s9   ;;  %s380_s9 = sphi %s398_s9, %s531_s9   ;;  %s376_s8 = sphi %s396_s8, %s530_s8   ;;  %s372_s7 = sphi %s394_s7, %s529_s7   ;;  %s368_s6 = sphi %s392_s6, %s528_s6  }
   0x6   : > { %s417_s12 = sadd.s32 1, %s380_s9   ;;  %s24_s13 = sadd.s32 1, %s376_s8 }
   0x7   : > { %s21_s14 = ssub.s32 %s380_s9, %s417_s12  ;;  %p31_p0 = scmp.ne.s32.totalorder %s376_s8, %s372_s7 }
   0x8   : > { %p22_p1 = scmp.eq.s32.totalorder %s21_s14, 0  ;;  %p32_p2 = scmp.eq.s32.totalorder %s380_s9, 0 }
   0x9   : > { %p37_p3 = scmp.ne.s32.totalorder %s372_s7, %s368_s6  ;;  %p38_p4 = scmp.eq.s32.totalorder %s413_s10, 0 }
   0xa   : > { %s429_s15 = scalar_select %p22_p1, %s376_s8, %s24_s13  }
   0xb   : > { %p431_p5 = por %p32_p2, %p31_p0  ;;  %p435_p6 = por %p38_p4, %p37_p3 }
   0xc   : > { %p61_p7 = scmp.eq.s32.totalorder %s413_s10, 1  ;;  %p67_p8 = scmp.eq.s32.totalorder %s226_s11, 1 }
   0xd   : > { %p250_p10 = scmp.lt.s32.totalorder %s380_s9, 2  ;;  %s87_s20 = sand.u32 1, %s376_s8  }
   0xe   : > { %p442_p11 = por %p61_p7, %p31_p0  ;;  %p446_p12 = por %p67_p8, %p37_p3 }
   0xf   : > { %s230_s21 = sshll.u32 %s380_s9, 1  ;;  %s229_s22 = sshll.u32 %s87_s20, 1 }
  0x10   : > { %s95_s25 = scalar_lea.hbm %s520_s0, %s230_s21  ;;  %s91_s27 = scalar_lea.vmem [#allocation2], %s229_s22 }
  0x11   : > { %s97_s26 = sshll.u32 %s95_s25, 4  ;;  %s99_s28 = sshll.u32 %s91_s27, 4  ;;  %s98_s26 = int_to_ptr.hbm [resolvable:$true] %s97_s26  ;;  %s100_s28 = int_to_ptr.vmem [resolvable:$true] %s99_s28 }
  0x12   : > { %p457_p13 = pnand %p250_p10, %p431_p5  ;;  %p231_p0 = scmp.ge.s32.totalorder %s380_s9, 1 }
  0x13   : > { %p104_p1 = scmp.lt.s32.totalorder %s380_s9, 3  ;;  %s88_s30 = scalar_lea.sflag [#allocation3], %s87_s20 }
  0x14   : > { %s284_s2 = sshra.s32 %s98_s26, 4  ;;  %p288_p3 = pneg %p457_p13  ;;  %s285_s2 = int_to_ptr.hbm [resolvable:$true] %s284_s2 }
  0x15   : > { %s286_s3 = scalar_lea.hbm %s285_s2, 2  ;;  %s291_s11 = scalar_lea.hbm %s520_s0, 4 }
  0x16   : > { %p287_p2 = scmp.ne.s32.totalorder %s285_s2, %s286_s3  ;;  %p292_p5 = scmp.lt.s32.totalorder %s285_s2, %s520_s0 }
  0x17   : > { %p293_p8 = scmp.lt.s32.totalorder %s291_s11, %s286_s3 }
  0x18   : > { %p289_p4 = pnand %p288_p3, %p287_p2 }
  0x19   : > { %p294_p10 = por %p293_p8, %p292_p5 }
  0x1a   : > { %p290_p7 = pneg %p289_p4 }
  0x1c   : > { %p295_p9 = pnand %p294_p10, %p290_p7 }
  0x1e   : > { %298 = shalt.err (!%p295_p9)
}
  0x1f   : > { %245 = dma.hbm_to_vmem [thread:$0]  (!%p457_p13), %s98_s26, 32, %s100_s28, %s88_s30  }
  0x20   : > { %p105_p2 = pnand %p231_p0, %p104_p1 }
  0x21   : > { %s478_s16 = sand.u32 (!%p105_p2), 1, %s372_s7  }
  0x22   : > { %108 = sbr.rel (%p105_p2) target bundleno = 55 (0x37), region = 24  ;;  %s232_s20 = sshll.u32 (!%p105_p2), %s478_s16, 1 }
  0x23   : > { %s111_s21 = scalar_lea.sflag (!%p105_p2), [#allocation3], %s478_s16  ;;  %s114_s22 = scalar_lea.vmem (!%p105_p2), [#allocation2], %s232_s20 }
  0x27   : > { %359 = dma.done.wait (%p435_p6), %s111_s21, 32  }
  0x28   : > { %361 = vsyncadd (%p435_p6), %s111_s21, 4294967264  ;;  %s233_s23 = sshll.u32 %s478_s16, 3  ;;  %s235_s24 = sshll.u32 %s413_s10, 3  ;;  %v134_v0 = vld [vmem:[%s114_s22] sm:$0x3] }
  0x29   : > { %v135_v1 = vunpack.c.0.s8 %v134_v0  ;;  %s151_s27 = scalar_lea.hbm %s521_s1, %s235_s24  ;;  %s133_s28 = scalar_lea.vmem [#allocation5], %s233_s23 }
  0x2a   : > { %s153_s29 = sshll.u32 %s133_s28, 4  ;;  %s155_s30 = sshll.u32 %s151_s27, 4  ;;  %s154_s29 = int_to_ptr.vmem [resolvable:$true] %s153_s29  ;;  %s156_s30 = int_to_ptr.hbm [resolvable:$true] %s155_s30 }
  0x2b   : > { %v136_v2 = vand.u32 255, %v135_v1  ;;  %s141_s17 = scalar_lea.sflag [#allocation4], %s478_s16  ;;  %s328_s2 = sshra.s32 %s156_s30, 4  ;;  %s329_s2 = int_to_ptr.hbm [resolvable:$true] %s328_s2 }
  0x2c   : > { %s330_s10 = scalar_lea.hbm %s329_s2, 8  ;;  %s334_s5 = scalar_lea.hbm %s521_s1, 16 }
  0x2d   : > { %v137_v3 = vcvt.s32.f32 %v136_v2  ;;  %p331_p6 = scmp.ne.s32.totalorder %s329_s2, %s330_s10  ;;  %p335_p0 = scmp.lt.s32.totalorder %s329_s2, %s521_s1 }
  0x2e   : > { %p336_p1 = scmp.lt.s32.totalorder %s334_s5, %s330_s10 }
  0x2f   : > { %v138_v4 = vmul.f32 0.003921569, %v137_v3  ;;  %p332_p9 = pnand %p331_p6, %p442_p11 }
  0x30   : > { %p337_p3 = por %p336_p1, %p335_p0 }
  0x31   : > { %139 = vst [vmem:[%s133_s28] sm:$0xff] %v138_v4  ;;  %p333_p13 = pneg %p332_p9 }
  0x33   : > { %p338_p4 = pnand %p337_p3, %p333_p13 }
  0x35   : > { %341 = shalt.err (!%p338_p4)
}
  0x36   : > { %240 = dma.vmem_to_hbm [thread:$0]  (%p442_p11), %s154_s29, 128, %s156_s30, %s141_s17  }
  0x37 PF: > { %s167_s14 = sand.u32 1, %s368_s6   ;;  %p527_p7 = scmp.ge.s32.totalorder %s380_s9, 2 }
  0x38   : > { %s168_s16 = scalar_lea.sflag [#allocation4], %s167_s14 }
  0x39   : > { %p247_p5 = pnand %p527_p7, %p446_p12 }
  0x3b   : > { %p248_p8 = pneg %p247_p5 }
  0x3d   : > { %363 = dma.done.wait (%p248_p8), %s168_s16, 128  }
  0x3e   : > { %365 = vsyncadd (%p248_p8), %s168_s16, 4294967168  ;;  %p14_p10 = scmp.ge.s32.totalorder %s417_s12, 4   ;;  %s528_s6 = smov %s372_s7 }
  0x3f   : > { %s529_s7 = smov %s376_s8  ;;  %s530_s8 = smov %s429_s15 }
  0x40   : > { %s531_s9 = smov %s417_s12  ;;  %16 = sbr.rel (!%p14_p10) target bundleno = 5 (0x5), region = 69 }
  0x45   :  { %174 = vsyncpa [#allocation3], 1 }
  0x46   :  { %176 = vsyncpa [#allocation3 + $0x1], 1 }
  0x47   :  { %177 = vsyncpa [#allocation4], 1 }
  0x48   :  { %179 = vsyncpa [#allocation4 + $0x1], 1 }

</bundles_post_ra>
